<compile_context>
chip_gen: v7x
topology: tpu7x:2x2x1
jax: 0.10.0
libtpu: 0.0.40
codegen_flags: <defaults>
</compile_context>

<pallas_src>
import jax
import jax.numpy as jnp
from jax.experimental import pallas as pl
from jax.experimental.pallas import tpu as pltpu

TEXT_DIM, CLIN_DIM, IMG_DIM = 85, 85, 86
FEAT_DIM = 32
COMBINED_DIM = 3 * FEAT_DIM                 # 96
TOTAL_DIM = TEXT_DIM + CLIN_DIM + IMG_DIM   # 256
H1_DIM = 64                                 # weight-net hidden 1
H2_DIM = 32                                 # weight-net hidden 2
MID_DIM = H2_DIM + 1                        # 33 = [weight-net hidden2 | quality pre-act]
SMALL_DIM = 4                               # packed small output: [w0, w1, w2, quality]

ROW_TILE = 2048                             # ~10-20 MiB of tiles/intermediates
VMEM_LIMIT_BYTES = 48 * 1024 * 1024         # > v5e 16 MiB default, < v7x 64 MiB physical


def _adaptive_weighting_kernel(
    t_ref, c_ref, i_ref,        # (TB, 85), (TB, 85), (TB, 86) embeddings
    wfeat_ref, bfeat_ref,       # (256, 96) bf16, (1, 96) f32   block-diag feature extractors
    wh1_ref, bh1_ref,           # (96, 96) bf16, (1, 96) f32    fused first layers (weight|quality)
    wmid_ref, bmid_ref,         # (96, 33) bf16, (1, 33) f32    fused second layers (block-diag)
    w3_ref, b3_ref,             # (32, 3) bf16, (1, 3) f32      weight-net final layer
    sel_ref,                    # (3, 256) bf16                 one-hot lane selector
    out_emb_ref,                # (TB, 256)  weighted embeddings
    out_small_ref,              # (TB, 4) f32 = [norm_w | quality]
):
    f32 = jnp.float32
    bf16 = jnp.bfloat16

    # Assemble the lane-dense (TB, 256) slab in-kernel; no wrapper HBM pass.
    x = jnp.concatenate([t_ref[...], c_ref[...], i_ref[...]], axis=-1)
    x_mm = x.astype(bf16)

    # Modality feature extraction (block-diagonal) + tanh -> "combined" (TB, 96) f32.
    combined = jnp.tanh(
        jnp.dot(x_mm, wfeat_ref[...], preferred_element_type=f32) + bfeat_ref[...]
    )

    # Fused first layers: [weight-net Linear(96,64) | quality-net Linear(96,32)] + ReLU.
    h = jnp.maximum(
        jnp.dot(combined.astype(bf16), wh1_ref[...], preferred_element_type=f32)
        + bh1_ref[...],
        0.0,
    )
    # Dropout(0.1): identity at inference.

    # Fused second layers (block-diag): cols 0:32 = weight-net hidden2 pre-act,
    # col 32 = quality-net pre-sigmoid.
    mid = (jnp.dot(h.astype(bf16), wmid_ref[...], preferred_element_type=f32)
           + bmid_ref[...])
    h2 = jnp.maximum(mid[:, 0:H2_DIM], 0.0)
    q_pre = mid[:, H2_DIM:MID_DIM]

    # Weight-net final layer.  Softmax normalize fused with the reference's
    # (sum + 1e-8) renorm (mask all-ones): norm_w = e / (sum_e * (1 + 1e-8)).
    logits = (jnp.dot(h2.astype(bf16), w3_ref[...], preferred_element_type=f32)
              + b3_ref[...])
    m = jnp.max(logits, axis=-1, keepdims=True)
    e = jnp.exp(logits - m)
    norm_w = e * pl.reciprocal(
        jnp.sum(e, axis=-1, keepdims=True) * (1.0 + 1e-8), approx=True
    )                                                                   # (TB, 3)

    # Quality sigmoid via EUP exp + approx reciprocal.
    quality = pl.reciprocal(1.0 + jnp.exp(-q_pre), approx=True)         # (TB, 1)

    # Per-lane scale via a tiny selector matmul (spare MXU push) instead of
    # iota + nested selects.
    scale = jnp.dot(norm_w.astype(bf16), sel_ref[...],
                    preferred_element_type=f32)                         # (TB, 256)
    out_emb_ref[...] = (x * scale).astype(out_emb_ref.dtype)

    # Pack the two tiny outputs into one (TB, 4) f32 slab (single output stream).
    out_small_ref[...] = jnp.concatenate([norm_w, quality], axis=-1)


def _pack_params(p):
    """Fuse per-layer PyTorch-style params into the kernel's fused bf16 weights.

    In production this would be done once (cached); it is tiny (<100 KiB)."""
    f32, bf16 = jnp.float32, jnp.bfloat16

    # Block-diagonal feature extractor: (256, 96)
    wfeat = jnp.zeros((TOTAL_DIM, COMBINED_DIM), f32)
    wfeat = wfeat.at[0:TEXT_DIM, 0:FEAT_DIM].set(p["wt"])
    wfeat = wfeat.at[TEXT_DIM:TEXT_DIM + CLIN_DIM, FEAT_DIM:2 * FEAT_DIM].set(p["wc"])
    wfeat = wfeat.at[TEXT_DIM + CLIN_DIM:TOTAL_DIM, 2 * FEAT_DIM:3 * FEAT_DIM].set(p["wi"])
    bfeat = jnp.concatenate([p["bt"], p["bc"], p["bi"]], axis=-1)       # (1, 96)

    # Fused first layers: [W1 (96,64) | Wq1 (96,32)] -> (96, 96)
    wh1 = jnp.concatenate([p["w1"], p["wq1"]], axis=-1)
    bh1 = jnp.concatenate([p["b1"], p["bq1"]], axis=-1)                 # (1, 96)

    # Fused second layers (block-diag): (96, 33)
    wmid = jnp.zeros((COMBINED_DIM, MID_DIM), f32)
    wmid = wmid.at[0:H1_DIM, 0:H2_DIM].set(p["w2"])
    wmid = wmid.at[H1_DIM:COMBINED_DIM, H2_DIM:MID_DIM].set(p["wq2"])
    bmid = jnp.concatenate([p["b2"], p["bq2"]], axis=-1)                # (1, 33)

    # One-hot lane selector: scale = norm_w @ sel broadcasts each modality
    # weight across its lane span of the (TB, 256) slab.
    sel = jnp.zeros((3, TOTAL_DIM), f32)
    sel = sel.at[0, 0:TEXT_DIM].set(1.0)
    sel = sel.at[1, TEXT_DIM:TEXT_DIM + CLIN_DIM].set(1.0)
    sel = sel.at[2, TEXT_DIM + CLIN_DIM:TOTAL_DIM].set(1.0)

    return (
        wfeat.astype(bf16), bfeat.astype(f32),
        wh1.astype(bf16), bh1.astype(f32),
        wmid.astype(bf16), bmid.astype(f32),
        p["w3"].astype(bf16), p["b3"].astype(f32),
        sel.astype(bf16),
    )


def adaptive_modality_weighting(text_emb, clinical_emb, image_emb, params,
                                *, row_tile=ROW_TILE):
    """Pallas forward. Returns (weighted_emb (B,256), weights (B,3), quality (B,)).

    Inputs may be bf16 (preferred, halves HBM traffic) or f32; the weighted
    output matches the input dtype; weights/quality are f32."""
    B = text_emb.shape[0]
    out_dtype = text_emb.dtype

    # Row tile: sublane-aligned, capped at ceil(B/2) so the "parallel" grid axis
    # has >= 2 steps whenever B allows (feeds both v7x TensorCores).  No batch
    # padding: Pallas handles the partial edge block (garbage rows never mix
    # across rows, and their output writes are clipped).
    half_rows = pl.cdiv(pl.cdiv(B, 2), 8) * 8
    tb = max(8, min(row_tile, half_rows))
    grid = (pl.cdiv(B, tb),)

    fused = _pack_params(params)

    row2d = lambda d: pl.BlockSpec((tb, d), lambda i: (i, 0))
    resident = lambda shape: pl.BlockSpec(shape, lambda i: (0, 0))  # VMEM-resident

    in_specs = [
        row2d(TEXT_DIM),                          # text_emb
        row2d(CLIN_DIM),                          # clinical_emb
        row2d(IMG_DIM),                           # image_emb
        resident((TOTAL_DIM, COMBINED_DIM)),      # wfeat
        resident((1, COMBINED_DIM)),              # bfeat
        resident((COMBINED_DIM, COMBINED_DIM)),   # wh1
        resident((1, COMBINED_DIM)),              # bh1
        resident((COMBINED_DIM, MID_DIM)),        # wmid
        resident((1, MID_DIM)),                   # bmid
        resident((H2_DIM, 3)),                    # w3
        resident((1, 3)),                         # b3
        resident((3, TOTAL_DIM)),                 # sel
    ]
    out_specs = (row2d(TOTAL_DIM), row2d(SMALL_DIM))
    out_shape = (
        jax.ShapeDtypeStruct((B, TOTAL_DIM), out_dtype),
        jax.ShapeDtypeStruct((B, SMALL_DIM), jnp.float32),
    )

    weighted, small = pl.pallas_call(
        _adaptive_weighting_kernel,
        out_shape=out_shape,
        grid=grid,
        in_specs=in_specs,
        out_specs=out_specs,
        compiler_params=pltpu.CompilerParams(
            dimension_semantics=("parallel",),     # megacore sharding on v7x
            vmem_limit_bytes=VMEM_LIMIT_BYTES,
        ),
    )(text_emb, clinical_emb, image_emb, *fused)

    weights = small[:, 0:3]
    quality = small[:, 3]                         # (B,)
    if B == 1:                                    # match PyTorch .squeeze() on (1,1)
        quality = jnp.squeeze(quality)
    return weighted, weights, quality


def init_params(key):
    """Deterministic synthetic init (PyTorch Linear-style uniform +/-1/sqrt(fan_in)).
    Weights stored as (in_dim, out_dim); biases as (1, out_dim)."""
    def linear(k, fan_in, fan_out):
        kw, kb = jax.random.split(k)
        lim = 1.0 / jnp.sqrt(jnp.float32(fan_in))
        w = jax.random.uniform(kw, (fan_in, fan_out), jnp.float32, -lim, lim)
        b = jax.random.uniform(kb, (1, fan_out), jnp.float32, -lim, lim)
        return w, b

    keys = jax.random.split(key, 8)
    wt, bt = linear(keys[0], TEXT_DIM, FEAT_DIM)
    wc, bc = linear(keys[1], CLIN_DIM, FEAT_DIM)
    wi, bi = linear(keys[2], IMG_DIM, FEAT_DIM)
    w1, b1 = linear(keys[3], COMBINED_DIM, H1_DIM)
    w2, b2 = linear(keys[4], H1_DIM, H2_DIM)
    w3, b3 = linear(keys[5], H2_DIM, 3)
    wq1, bq1 = linear(keys[6], COMBINED_DIM, H2_DIM)
    wq2, bq2 = linear(keys[7], H2_DIM, 1)
    return dict(
        wt=wt, bt=bt, wc=wc, bc=bc, wi=wi, bi=bi,
        w1=w1, b1=b1, w2=w2, b2=b2, w3=w3, b3=b3,
        wq1=wq1, bq1=bq1, wq2=wq2, bq2=bq2,
    )


def _reference(text_emb, clinical_emb, image_emb, p):
    """Pure-JAX f32 reference (exact divides, f32 weights) for sanity checking."""
    t = text_emb.astype(jnp.float32)
    c = clinical_emb.astype(jnp.float32)
    i = image_emb.astype(jnp.float32)
    ft = jnp.tanh(t @ p["wt"] + p["bt"])
    fc = jnp.tanh(c @ p["wc"] + p["bc"])
    fi = jnp.tanh(i @ p["wi"] + p["bi"])
    comb = jnp.concatenate([ft, fc, fi], axis=-1)
    h = jax.nn.relu(comb @ p["w1"] + p["b1"])
    h = jax.nn.relu(h @ p["w2"] + p["b2"])
    raw = jax.nn.softmax(h @ p["w3"] + p["b3"], axis=-1)
    masked = raw * jnp.ones((1, 3), jnp.float32)
    norm = masked / (jnp.sum(masked, axis=-1, keepdims=True) + 1e-8)
    q = jax.nn.relu(comb @ p["wq1"] + p["bq1"])
    q = jax.nn.sigmoid(q @ p["wq2"] + p["bq2"])
    weighted = jnp.concatenate(
        [t * norm[:, 0:1], c * norm[:, 1:2], i * norm[:, 2:3]], axis=-1
    )
    return weighted, norm, jnp.squeeze(q)


def _check(B, key, params, row_tile=ROW_TILE):
    kt, kc, ki = jax.random.split(key, 3)
    # Inputs generated directly in bf16 ("cast at the source"): HBM-bound kernel,
    # bf16 I/O halves traffic.
    text_emb = jax.random.normal(kt, (B, TEXT_DIM), jnp.bfloat16)
    clinical_emb = jax.random.normal(kc, (B, CLIN_DIM), jnp.bfloat16)
    image_emb = jax.random.normal(ki, (B, IMG_DIM), jnp.bfloat16)

    weighted, weights, quality = adaptive_modality_weighting(
        text_emb, clinical_emb, image_emb, params, row_tile=row_tile
    )
    jax.block_until_ready((weighted, weights, quality))

    ref_weighted, ref_weights, ref_quality = _reference(
        text_emb, clinical_emb, image_emb, params
    )
    assert weighted.shape == (B, TOTAL_DIM)
    assert weights.shape == (B, 3)
    assert quality.shape == (B,)
    # Tolerances sized for bf16 I/O + bf16 MXU operands + EUP approx reciprocals.
    tol = dict(atol=2e-2, rtol=2e-2)
    assert jnp.allclose(weighted.astype(jnp.float32), ref_weighted, **tol)
    assert jnp.allclose(weights, ref_weights, **tol)
    assert jnp.allclose(quality, ref_quality, **tol)


if __name__ == "__main__":
    key = jax.random.PRNGKey(0)
    kp, k1, k2, k3 = jax.random.split(key, 4)
    params = init_params(kp)

    # Small shape: B=2 -> one partial 8-row block, single grid step.
    _check(2, k1, params)
    # Multi-step grid with a partial edge block: B=19, row_tile=8 -> 3 steps.
    _check(19, k2, params, row_tile=8)
    # Default tile path: B=300 -> tb=152, 2 grid steps (both v7x TCs), edge clip.
    _check(300, k3, params)

    print("KERNEL_OK")
</pallas_src>

<mosaic_0001>
module attributes {stable_mosaic.version = 11 : i64} {
  func.func @_adaptive_weighting_kernel(%arg0: i32, %arg1: memref<8x85xbf16, #tpu.memory_space<vmem>>, %arg2: memref<8x85xbf16, #tpu.memory_space<vmem>>, %arg3: memref<8x86xbf16, #tpu.memory_space<vmem>>, %arg4: memref<256x96xbf16, #tpu.memory_space<vmem>>, %arg5: memref<1x96xf32, #tpu.memory_space<vmem>>, %arg6: memref<96x96xbf16, #tpu.memory_space<vmem>>, %arg7: memref<1x96xf32, #tpu.memory_space<vmem>>, %arg8: memref<96x33xbf16, #tpu.memory_space<vmem>>, %arg9: memref<1x33xf32, #tpu.memory_space<vmem>>, %arg10: memref<32x3xbf16, #tpu.memory_space<vmem>>, %arg11: memref<1x3xf32, #tpu.memory_space<vmem>>, %arg12: memref<3x256xbf16, #tpu.memory_space<vmem>>, %arg13: memref<8x256xbf16, #tpu.memory_space<vmem>>, %arg14: memref<8x4xf32, #tpu.memory_space<vmem>>) attributes {dimension_semantics = [#tpu.dimension_semantics<parallel>], iteration_bounds = array<i64: 1>, scalar_prefetch = 0 : i64, scratch_operands = 0 : i64, tpu.core_type = #tpu.core_type<tc>, window_params = [{transform_indices = @transform_0, window_bounds = array<i64: 8, 85>}, {transform_indices = @transform_1, window_bounds = array<i64: 8, 85>}, {transform_indices = @transform_2, window_bounds = array<i64: 8, 86>}, {pipeline_mode = #tpu.pipeline_mode<synchronous>, transform_indices = @transform_3, window_bounds = array<i64: 256, 96>}, {pipeline_mode = #tpu.pipeline_mode<synchronous>, transform_indices = @transform_4, window_bounds = array<i64: 1, 96>}, {pipeline_mode = #tpu.pipeline_mode<synchronous>, transform_indices = @transform_5, window_bounds = array<i64: 96, 96>}, {pipeline_mode = #tpu.pipeline_mode<synchronous>, transform_indices = @transform_6, window_bounds = array<i64: 1, 96>}, {pipeline_mode = #tpu.pipeline_mode<synchronous>, transform_indices = @transform_7, window_bounds = array<i64: 96, 33>}, {pipeline_mode = #tpu.pipeline_mode<synchronous>, transform_indices = @transform_8, window_bounds = array<i64: 1, 33>}, {pipeline_mode = #tpu.pipeline_mode<synchronous>, transform_indices = @transform_9, window_bounds = array<i64: 32, 3>}, {pipeline_mode = #tpu.pipeline_mode<synchronous>, transform_indices = @transform_10, window_bounds = array<i64: 1, 3>}, {pipeline_mode = #tpu.pipeline_mode<synchronous>, transform_indices = @transform_11, window_bounds = array<i64: 3, 256>}, {transform_indices = @transform_12, window_bounds = array<i64: 8, 256>}, {transform_indices = @transform_13, window_bounds = array<i64: 8, 4>}]} {
    %c0 = arith.constant 0 : index
    %c0_0 = arith.constant 0 : index
    %0 = vector.load %arg1[%c0, %c0_0] : memref<8x85xbf16, #tpu.memory_space<vmem>>, vector<8x85xbf16>
    %c0_1 = arith.constant 0 : index
    %c0_2 = arith.constant 0 : index
    %1 = vector.load %arg2[%c0_1, %c0_2] : memref<8x85xbf16, #tpu.memory_space<vmem>>, vector<8x85xbf16>
    %c0_3 = arith.constant 0 : index
    %c0_4 = arith.constant 0 : index
    %2 = vector.load %arg3[%c0_3, %c0_4] : memref<8x86xbf16, #tpu.memory_space<vmem>>, vector<8x86xbf16>
    %3 = tpu.concatenate %0, %1, %2 in 1 : vector<8x85xbf16>, vector<8x85xbf16>, vector<8x86xbf16> -> vector<8x256xbf16>
    %c0_5 = arith.constant 0 : index
    %c0_6 = arith.constant 0 : index
    %4 = vector.load %arg4[%c0_5, %c0_6] : memref<256x96xbf16, #tpu.memory_space<vmem>>, vector<256x96xbf16>
    %cst = arith.constant dense<0.000000e+00> : vector<8x96xf32>
    %5 = tpu.matmul %3, %4, %cst {dimension_numbers = #tpu.dot_dimension_numbers<[1], [0], [0], [1], [0, 0, 1, 1], [], []>} : vector<8x256xbf16>, vector<256x96xbf16>, vector<8x96xf32> -> vector<8x96xf32>
    %c0_7 = arith.constant 0 : index
    %c0_8 = arith.constant 0 : index
    %6 = vector.load %arg5[%c0_7, %c0_8] : memref<1x96xf32, #tpu.memory_space<vmem>>, vector<1x96xf32>
    %7 = vector.broadcast %6 : vector<1x96xf32> to vector<8x96xf32>
    %8 = arith.addf %5, %7 : vector<8x96xf32>
    %9 = math.tanh %8 : vector<8x96xf32>
    %10 = arith.truncf %9 : vector<8x96xf32> to vector<8x96xbf16>
    %c0_9 = arith.constant 0 : index
    %c0_10 = arith.constant 0 : index
    %11 = vector.load %arg6[%c0_9, %c0_10] : memref<96x96xbf16, #tpu.memory_space<vmem>>, vector<96x96xbf16>
    %cst_11 = arith.constant dense<0.000000e+00> : vector<8x96xf32>
    %12 = tpu.matmul %10, %11, %cst_11 {dimension_numbers = #tpu.dot_dimension_numbers<[1], [0], [0], [1], [0, 0, 1, 1], [], []>} : vector<8x96xbf16>, vector<96x96xbf16>, vector<8x96xf32> -> vector<8x96xf32>
    %c0_12 = arith.constant 0 : index
    %c0_13 = arith.constant 0 : index
    %13 = vector.load %arg7[%c0_12, %c0_13] : memref<1x96xf32, #tpu.memory_space<vmem>>, vector<1x96xf32>
    %14 = vector.broadcast %13 : vector<1x96xf32> to vector<8x96xf32>
    %15 = arith.addf %12, %14 : vector<8x96xf32>
    %cst_14 = arith.constant 0.000000e+00 : f32
    %16 = vector.broadcast %cst_14 : f32 to vector<8x96xf32>
    %17 = arith.maximumf %15, %16 : vector<8x96xf32>
    %18 = arith.truncf %17 : vector<8x96xf32> to vector<8x96xbf16>
    %c0_15 = arith.constant 0 : index
    %c0_16 = arith.constant 0 : index
    %19 = vector.load %arg8[%c0_15, %c0_16] : memref<96x33xbf16, #tpu.memory_space<vmem>>, vector<96x33xbf16>
    %cst_17 = arith.constant dense<0.000000e+00> : vector<8x33xf32>
    %20 = tpu.matmul %18, %19, %cst_17 {dimension_numbers = #tpu.dot_dimension_numbers<[1], [0], [0], [1], [0, 0, 1, 1], [], []>} : vector<8x96xbf16>, vector<96x33xbf16>, vector<8x33xf32> -> vector<8x33xf32>
    %c0_18 = arith.constant 0 : index
    %c0_19 = arith.constant 0 : index
    %21 = vector.load %arg9[%c0_18, %c0_19] : memref<1x33xf32, #tpu.memory_space<vmem>>, vector<1x33xf32>
    %22 = vector.broadcast %21 : vector<1x33xf32> to vector<8x33xf32>
    %23 = arith.addf %20, %22 : vector<8x33xf32>
    %24 = vector.extract_strided_slice %23 {offsets = [0, 0], sizes = [8, 32], strides = [1, 1]} : vector<8x33xf32> to vector<8x32xf32>
    %cst_20 = arith.constant 0.000000e+00 : f32
    %25 = vector.broadcast %cst_20 : f32 to vector<8x32xf32>
    %26 = arith.maximumf %24, %25 : vector<8x32xf32>
    %27 = vector.extract_strided_slice %23 {offsets = [0, 32], sizes = [8, 1], strides = [1, 1]} : vector<8x33xf32> to vector<8x1xf32>
    %28 = arith.truncf %26 : vector<8x32xf32> to vector<8x32xbf16>
    %c0_21 = arith.constant 0 : index
    %c0_22 = arith.constant 0 : index
    %29 = vector.load %arg10[%c0_21, %c0_22] : memref<32x3xbf16, #tpu.memory_space<vmem>>, vector<32x3xbf16>
    %cst_23 = arith.constant dense<0.000000e+00> : vector<8x3xf32>
    %30 = tpu.matmul %28, %29, %cst_23 {dimension_numbers = #tpu.dot_dimension_numbers<[1], [0], [0], [1], [0, 0, 1, 1], [], []>} : vector<8x32xbf16>, vector<32x3xbf16>, vector<8x3xf32> -> vector<8x3xf32>
    %c0_24 = arith.constant 0 : index
    %c0_25 = arith.constant 0 : index
    %31 = vector.load %arg11[%c0_24, %c0_25] : memref<1x3xf32, #tpu.memory_space<vmem>>, vector<1x3xf32>
    %32 = vector.broadcast %31 : vector<1x3xf32> to vector<8x3xf32>
    %33 = arith.addf %30, %32 : vector<8x3xf32>
    %cst_26 = arith.constant dense<0xFF800000> : vector<8xf32>
    %34 = vector.multi_reduction <maximumf>, %33, %cst_26 [1] : vector<8x3xf32> to vector<8xf32>
    %35 = vector.shape_cast %34 : vector<8xf32> to vector<8x1xf32>
    %36 = vector.broadcast %35 : vector<8x1xf32> to vector<8x3xf32>
    %37 = arith.subf %33, %36 : vector<8x3xf32>
    %38 = math.exp %37 : vector<8x3xf32>
    %cst_27 = arith.constant dense<0.000000e+00> : vector<8xf32>
    %39 = vector.multi_reduction <add>, %38, %cst_27 [1] : vector<8x3xf32> to vector<8xf32>
    %40 = vector.shape_cast %39 : vector<8xf32> to vector<8x1xf32>
    %cst_28 = arith.constant 1.000000e+00 : f32
    %41 = vector.broadcast %cst_28 : f32 to vector<8x1xf32>
    %42 = arith.mulf %40, %41 : vector<8x1xf32>
    %43 = tpu.reciprocal %42 {approx = true} : vector<8x1xf32> -> vector<8x1xf32>
    %44 = vector.broadcast %43 : vector<8x1xf32> to vector<8x3xf32>
    %45 = arith.mulf %38, %44 : vector<8x3xf32>
    %cst_29 = arith.constant 0.000000e+00 : f32
    %46 = vector.broadcast %cst_29 : f32 to vector<8x1xf32>
    %47 = arith.subf %46, %27 : vector<8x1xf32>
    %48 = math.exp %47 : vector<8x1xf32>
    %cst_30 = arith.constant 1.000000e+00 : f32
    %49 = vector.broadcast %cst_30 : f32 to vector<8x1xf32>
    %50 = arith.addf %49, %48 : vector<8x1xf32>
    %51 = tpu.reciprocal %50 {approx = true} : vector<8x1xf32> -> vector<8x1xf32>
    %52 = arith.truncf %45 : vector<8x3xf32> to vector<8x3xbf16>
    %c0_31 = arith.constant 0 : index
    %c0_32 = arith.constant 0 : index
    %53 = vector.load %arg12[%c0_31, %c0_32] : memref<3x256xbf16, #tpu.memory_space<vmem>>, vector<3x256xbf16>
    %cst_33 = arith.constant dense<0.000000e+00> : vector<8x256xf32>
    %54 = tpu.matmul %52, %53, %cst_33 {dimension_numbers = #tpu.dot_dimension_numbers<[1], [0], [0], [1], [0, 0, 1, 1], [], []>} : vector<8x3xbf16>, vector<3x256xbf16>, vector<8x256xf32> -> vector<8x256xf32>
    %55 = arith.extf %3 : vector<8x256xbf16> to vector<8x256xf32>
    %56 = arith.mulf %55, %54 : vector<8x256xf32>
    %57 = arith.truncf %56 : vector<8x256xf32> to vector<8x256xbf16>
    %c0_34 = arith.constant 0 : index
    %c0_35 = arith.constant 0 : index
    %58 = vector.load %arg13[%c0_34, %c0_35] : memref<8x256xbf16, #tpu.memory_space<vmem>>, vector<8x256xbf16>
    tpu.vector_store %arg13[%c0_34, %c0_35], %57 {strides = array<i32>} : memref<8x256xbf16, #tpu.memory_space<vmem>>, vector<8x256xbf16>,
    %59 = tpu.concatenate %45, %51 in 1 : vector<8x3xf32>, vector<8x1xf32> -> vector<8x4xf32>
    %c0_36 = arith.constant 0 : index
    %c0_37 = arith.constant 0 : index
    %60 = vector.load %arg14[%c0_36, %c0_37] : memref<8x4xf32, #tpu.memory_space<vmem>>, vector<8x4xf32>
    tpu.vector_store %arg14[%c0_36, %c0_37], %59 {strides = array<i32>} : memref<8x4xf32, #tpu.memory_space<vmem>>, vector<8x4xf32>,
    return
  }
  func.func @transform_0(%arg0: i32) -> (i32, i32) {
    %c0_i32 = arith.constant 0 : i32
    %c0_i32_0 = arith.constant 0 : i32
    return %arg0, %c0_i32 : i32, i32
  }
  func.func @transform_1(%arg0: i32) -> (i32, i32) {
    %c0_i32 = arith.constant 0 : i32
    %c0_i32_0 = arith.constant 0 : i32
    return %arg0, %c0_i32 : i32, i32
  }
  func.func @transform_2(%arg0: i32) -> (i32, i32) {
    %c0_i32 = arith.constant 0 : i32
    %c0_i32_0 = arith.constant 0 : i32
    return %arg0, %c0_i32 : i32, i32
  }
  func.func @transform_3(%arg0: i32) -> (i32, i32) {
    %c0_i32 = arith.constant 0 : i32
    %c0_i32_0 = arith.constant 0 : i32
    %c0_i32_1 = arith.constant 0 : i32
    return %c0_i32, %c0_i32_0 : i32, i32
  }
  func.func @transform_4(%arg0: i32) -> (i32, i32) {
    %c0_i32 = arith.constant 0 : i32
    %c0_i32_0 = arith.constant 0 : i32
    %c0_i32_1 = arith.constant 0 : i32
    return %c0_i32, %c0_i32_0 : i32, i32
  }
  func.func @transform_5(%arg0: i32) -> (i32, i32) {
    %c0_i32 = arith.constant 0 : i32
    %c0_i32_0 = arith.constant 0 : i32
    %c0_i32_1 = arith.constant 0 : i32
    return %c0_i32, %c0_i32_0 : i32, i32
  }
  func.func @transform_6(%arg0: i32) -> (i32, i32) {
    %c0_i32 = arith.constant 0 : i32
    %c0_i32_0 = arith.constant 0 : i32
    %c0_i32_1 = arith.constant 0 : i32
    return %c0_i32, %c0_i32_0 : i32, i32
  }
  func.func @transform_7(%arg0: i32) -> (i32, i32) {
    %c0_i32 = arith.constant 0 : i32
    %c0_i32_0 = arith.constant 0 : i32
    %c0_i32_1 = arith.constant 0 : i32
    return %c0_i32, %c0_i32_0 : i32, i32
  }
  func.func @transform_8(%arg0: i32) -> (i32, i32) {
    %c0_i32 = arith.constant 0 : i32
    %c0_i32_0 = arith.constant 0 : i32
    %c0_i32_1 = arith.constant 0 : i32
    return %c0_i32, %c0_i32_0 : i32, i32
  }
  func.func @transform_9(%arg0: i32) -> (i32, i32) {
    %c0_i32 = arith.constant 0 : i32
    %c0_i32_0 = arith.constant 0 : i32
    %c0_i32_1 = arith.constant 0 : i32
    return %c0_i32, %c0_i32_0 : i32, i32
  }
  func.func @transform_10(%arg0: i32) -> (i32, i32) {
    %c0_i32 = arith.constant 0 : i32
    %c0_i32_0 = arith.constant 0 : i32
    %c0_i32_1 = arith.constant 0 : i32
    return %c0_i32, %c0_i32_0 : i32, i32
  }
  func.func @transform_11(%arg0: i32) -> (i32, i32) {
    %c0_i32 = arith.constant 0 : i32
    %c0_i32_0 = arith.constant 0 : i32
    %c0_i32_1 = arith.constant 0 : i32
    return %c0_i32, %c0_i32_0 : i32, i32
  }
  func.func @transform_12(%arg0: i32) -> (i32, i32) {
    %c0_i32 = arith.constant 0 : i32
    %c0_i32_0 = arith.constant 0 : i32
    return %arg0, %c0_i32 : i32, i32
  }
  func.func @transform_13(%arg0: i32) -> (i32, i32) {
    %c0_i32 = arith.constant 0 : i32
    %c0_i32_0 = arith.constant 0 : i32
    return %arg0, %c0_i32 : i32, i32
  }
}

</mosaic_0001>

<bundles_post_ra>
// kernel: tpu_custom_call.1
= control target key start
LH: loop header
LB: loop body
LE: loop exit
PB: predicated region body
PF: predicated region fallthrough
CT: control target
= control target key end

     0   :  { %19 = vsyncpa [#allocation3], 0  ;;  %v67_v2 = vlaneseq  ;;  %v983_v5 = vmov 1966171168   ;;  %s1278_s0 = inlined_call_operand.vmem [shape: bf16[2,85], index: 0, kind: input, shape index: {}]   ;;  %s1279_s1 = inlined_call_operand.vmem [shape: bf16[2,85], index: 1, kind: input, shape index: {}]   ;;  %s1280_s2 = inlined_call_operand.vmem [shape: bf16[2,86], index: 2, kind: input, shape index: {}]   ;;  %s1281_s3 = inlined_call_operand.vmem [shape: bf16[256,96], index: 3, kind: input, shape index: {}]   ;;  %s1282_s4 = inlined_call_operand.vmem [shape: f32[1,96], index: 4, kind: input, shape index: {}]   ;;  %s1283_s5 = inlined_call_operand.vmem [shape: bf16[96,96], index: 5, kind: input, shape index: {}]   ;;  %s1284_s6 = inlined_call_operand.vmem [shape: f32[1,96], index: 6, kind: input, shape index: {}]   ;;  %s1285_s7 = inlined_call_operand.vmem [shape: bf16[96,33], index: 7, kind: input, shape index: {}]   ;;  %s1286_s8 = inlined_call_operand.vmem [shape: f32[1,33], index: 8, kind: input, shape index: {}]   ;;  %s1287_s9 = inlined_call_operand.vmem [shape: bf16[32,3], index: 9, kind: input, shape index: {}]   ;;  %s1288_s10 = inlined_call_operand.vmem [shape: f32[1,3], index: 10, kind: input, shape index: {}]   ;;  %s1289_s11 = inlined_call_operand.vmem [shape: bf16[3,256], index: 11, kind: input, shape index: {}]   ;;  %s1290_s12 = inlined_call_operand.hbm [shape: bf16[2,256], index: 12, kind: output, shape index: {0}]   ;;  %s1291_s13 = inlined_call_operand.hbm [shape: f32[2,4], index: 13, kind: output, shape index: {1}]  }
   0x1   :  { %v50_v0 = vld [vmem:[%s1279_s1] sm:$0x1]  ;;  %v51_v1 = vld [vmem:[%s1279_s1 + $0x1] sm:$0x1]  ;;  %v52_v3 = vld [vmem:[%s1279_s1 + $0x2] sm:$0x1]  ;;  %v65_v6 = vunpack.c.l.s4 %v983_v5 }
   0x2   :  { %v53_v4 = vld [vmem:[%s1279_s1 + $0x3] sm:$0x1]  ;;  %v68_v7 = vshrl.u32 %v67_v2, 7  ;;  %v54_v8 = vld [vmem:[%s1280_s2] sm:$0x1]  ;;  %v90_v11 = vcombine.low %v50_v0, %v51_v1 }
   0x3   :  { %v55_v9 = vld [vmem:[%s1280_s2 + $0x1] sm:$0x1]  ;;  %v56_v12 = vld [vmem:[%s1280_s2 + $0x2] sm:$0x1]  ;;  %v57_v13 = vld [vmem:[%s1280_s2 + $0x3] sm:$0x1] }
   0x4   :  { %v895_v10 = vld [vmem:[%s1281_s3 + $0x40] sm:$0xff]  }
   0x5   :  { %20 = vsyncpa [#allocation5], 0  ;;  %v66_v14 = vunpack.c.0.s8 %v65_v6  ;;  %v91_v15 = vcombine.low %v52_v3, %v53_v4  ;;  %v120_v16 = vcombine.low %v54_v8, %v55_v9  ;;  %v121_v17 = vcombine.low %v56_v12, %v57_v13  ;;  %804 = vmatprep.subr.bf16.mxu0 %v895_v10  ;;  %v896_v18 = vld [vmem:[%s1281_s3] sm:$0xff]   ;;  %v897_v20 = vld [vmem:[%s1281_s3 + $0x48] sm:$0xff]   ;;  %s985_s19 = smov 85   ;;  %s986_s1 = smov 42  }
   0x6   :  { %805 = vmatpush3.bf16.msra.mxu0 %v896_v18  ;;  %v898_v21 = vld [vmem:[%s1281_s3 + $0x8] sm:$0xff]   ;;  %v899_v26 = vld [vmem:[%s1281_s3 + $0x50] sm:$0xff]   ;;  %v984_v27 = vmov 0.0   ;;  %v901_v32 = vld [vmem:[%s1281_s3 + $0x58] sm:$0xff]   ;;  %vm151_vm0 = vcmask 343040   ;;  %vm146_vm1 = vcmask 695296  }
   0x7   :  { %v1095_v19 = vsub.s32 %v66_v14, %v68_v7  ;;  %806 = vmatprep.subr.bf16.mxu0 %v897_v20  ;;  %843 = vmatprep.subr.bf16.mxu1 %v984_v27  ;;  %v900_v30 = vld [vmem:[%s1281_s3 + $0x10] sm:$0xff]   ;;  %v902_v34 = vld [vmem:[%s1281_s3 + $0x18] sm:$0xff]   ;;  %v903_v35 = vld [vmem:[%s1281_s3 + $0x60] sm:$0xff]   ;;  %vm987_vm2 = vmmov 0   ;;  %vm387_vm3 = vcmask 785408   ;;  %vm556_vm4 = vcmask 261120  }
   0x8   :  { %v904_v36 = vld [vmem:[%s1281_s3 + $0x20] sm:$0xff]   ;;  %v905_v37 = vld [vmem:[%s1281_s3 + $0x68] sm:$0xff]   ;;  %v907_v40 = vld [vmem:[%s1281_s3 + $0x70] sm:$0xff]   ;;  %855 = vmatprep.mubr.msk.bf16.mxu1 %vm987_vm2, %v984_v27  ;;  %vm600_vm5 = vcmask 23552   ;;  %vm631_vm6 = vcmask 1040384   ;;  %vm632_vm7 = vcmask 1041408  }
   0x9   :  { %v98_v22 = vrot.slane %v90_v11, %v1095_v19  ;;  %v105_v23 = vrot.slane %v91_v15, %v1095_v19  ;;  %v128_v24 = vrot.slane %v120_v16, %v1095_v19  ;;  %v135_v25 = vrot.slane %v121_v17, %v1095_v19  ;;  %v906_v38 = vld [vmem:[%s1281_s3 + $0x28] sm:$0xff]   ;;  %v911_v39 = vld [vmem:[%s1283_s5] sm:$0xff]   ;;  %v908_v41 = vld [vmem:[%s1281_s3 + $0x30] sm:$0xff]  }
   0xa   :  { %807 = vmatpush3.bf16.msra.mxu0 %v898_v21  ;;  %844 = vmatpush3.bf16.msra.mxu1 %v911_v39  ;;  %v909_v42 = vld [vmem:[%s1281_s3 + $0x78] sm:$0xff]   ;;  %v46_v44 = vld [vmem:[%s1278_s0] sm:$0x1]  ;;  %v47_v45 = vld [vmem:[%s1278_s0 + $0x1] sm:$0x1]  ;;  %vm728_vm8 = vcmask 31744  }
   0xb   :  { %v106_v28 = vcombine.low %v98_v22, %v105_v23  ;;  %v136_v29 = vcombine.low %v128_v24, %v135_v25  ;;  %808 = vmatprep.subr.bf16.mxu0 %v899_v26  ;;  %845 = vmatprep.subr.bf16.mxu1 %v984_v27  ;;  %v910_v43 = vld [vmem:[%s1281_s3 + $0x38] sm:$0xff]   ;;  %v48_v46 = vld [vmem:[%s1278_s0 + $0x2] sm:$0x1]  ;;  %v49_v47 = vld [vmem:[%s1278_s0 + $0x3] sm:$0x1]  ;;  %v62_v48 = vcombine.low %v46_v44, %v47_v45 }
   0xc   :  { %v63_v49 = vcombine.low %v48_v46, %v49_v47  ;;  %v912_v58 = vld [vmem:[%s1283_s5 + $0x8] sm:$0xff]   ;;  %v913_v59 = vld [vmem:[%s1283_s5 + $0x10] sm:$0xff]   ;;  %v914_v60 = vld [vmem:[%s1283_s5 + $0x18] sm:$0xff]  }
   0xd   :  { %v113_v31 = vrot.slane %v106_v28, %v1095_v19  ;;  %v143_v33 = vrot.slane %v136_v29, %v1095_v19  ;;  %v70_v50 = vrot.slane %v62_v48, %v1095_v19  ;;  %v915_v61 = vld [vmem:[%s1283_s5 + $0x20] sm:$0xff]   ;;  %v916_v62 = vld [vmem:[%s1283_s5 + $0x28] sm:$0xff]   ;;  %v919_v10 = vld [vmem:[%s1285_s7 + $0x10] sm:$0xff]  }
   0xe   :  { %809 = vmatpush3.bf16.msra.mxu0 %v900_v30  ;;  %v77_v51 = vrot.slane %v63_v49, %v1095_v19  ;;  %846 = vmatpush3.bf16.msra.mxu1 %v912_v58  ;;  %v762_v0 = vld [vmem:[%s1282_s4] ss:$0 sm:$0xff]  ;;  %v918_v9 = vld [vmem:[%s1285_s7 + $0x8] sm:$0xff]   ;;  %v920_v11 = vld [vmem:[%s1285_s7 + $0x18] sm:$0xff]  }
   0xf   :  { %114 = vrot.lane.b32.xlu0 %v113_v31, %s985_s19  ;;  %810 = vmatprep.subr.bf16.mxu0 %v901_v32  ;;  %v917_v7 = vld [vmem:[%s1285_s7] sm:$0xff]   ;;  %v922_v13 = vld [vmem:[%s1285_s7 + $0x28] sm:$0xff]  }
  0x10   :  { %v78_v52 = vcombine.low %v70_v50, %v77_v51  ;;  %847 = vmatprep.subr.bf16.mxu1 %v984_v27  ;;  %v921_v12 = vld [vmem:[%s1285_s7 + $0x20] sm:$0xff]   ;;  %v924_v24 = vld [vmem:[%s1287_s9 + $0x8] sm:$0xff]  }
  0x11   :  { %v923_v14 = vld [vmem:[%s1287_s9] sm:$0xff]  }
  0x12   :  { %811 = vmatpush3.bf16.msra.mxu0 %v902_v34  ;;  %v85_v54 = vrot.slane %v78_v52, %v1095_v19  ;;  %848 = vmatpush3.bf16.msra.mxu1 %v913_v59  ;;  %v779_v15 = vld [vmem:[%s1284_s6] ss:$0 sm:$0xff]  ;;  %s988_s6 = smov 99   ;;  %v989_v52 = vmov 65535   ;;  %v990_v59 = vmov 0  }
  0x13   :  { %144 = vrot.lane.b32.xlu0 %v143_v33, %s986_s1  ;;  %812 = vmatprep.subr.bf16.mxu0 %v903_v35  ;;  %v787_v25 = vld [vmem:[%s1286_s8] ss:$0 sm:$0xff] }
  0x14   :  { %849 = vmatprep.subr.bf16.mxu1 %v984_v27  ;;  %v799_v50 = vld.sshfl [vmem:[%s1289_s11] sm:$0x33 pattern:$0x76325410] }
  0x15   :  { %v627_v51 = vcombine.high %v799_v50, %v799_v50 }
  0x16   :  { %813 = vmatpush3.bf16.msra.mxu0 %v904_v36  ;;  %850 = vmatpush3.bf16.msra.mxu1 %v914_v60 }
  0x17   :  { %814 = vmatprep.subr.bf16.mxu0 %v905_v37  ;;  %851 = vmatprep.subr.bf16.mxu1 %v984_v27 }
  0x1a   :  { %815 = vmatpush3.bf16.msra.mxu0 %v906_v38  ;;  %852 = vmatpush3.bf16.msra.mxu1 %v915_v61  ;;  %v795_v38 = vld [vmem:[%s1288_s10] ss:$0 sm:$0xff] }
  0x1b   :  { %816 = vmatprep.subr.bf16.mxu0 %v907_v40  ;;  %853 = vmatprep.subr.bf16.mxu1 %v984_v27 }
  0x1e   :  { %817 = vmatpush3.bf16.msra.mxu0 %v908_v41  ;;  %854 = vmatpush3.bf16.msra.mxu1 %v916_v62 }
  0x1f   :  { %818 = vmatprep.subr.bf16.mxu0 %v909_v42  ;;  %859 = vmatprep.subr.bf16.mxu1 %v984_v27 }
  0x22   :  { %819 = vmatpush3.bf16.msra.mxu0 %v910_v43 }
  0x23   :  { %875 = vmatprep.subr.bf16.mxu0 %v984_v27 }
  0x81   :  { %v115_v53 = vpop.permute.xlu0 %114 }
  0x82   :  { %v1169_v57 = vsel %vm146_vm1, %v85_v54, %v115_v53 }
  0x85   :  { %v145_v55 = vpop.permute.xlu0 %144 }
  0x86   :  { %v1166_v56 = vsel %vm151_vm0, %v115_v53, %v145_v55  ;;  %v633_v53 = vsel %vm631_vm6, 4294967295, %v989_v52 }
  0x87   :  { %322 = vmatprep.mubr.bf16.mxu0 %v1166_v56  ;;  %v634_v54 = vsel %vm632_vm7, %v633_v53, 0 }
  0x88   :  { %323 = vmatmul.mubr.bf16.vlgmr.msra.gmra.mrb[0].mxu0 %v1169_v57  ;;  %v639_v55 = vand.u32 %v634_v54, %v627_v51  ;;  %v636_v58 = vand.u32 %v799_v50, %v634_v54 }
  0x89   :  { %879 = vmatprep.mubr.msk.bf16.mxu0 %vm987_vm2, %v984_v27  ;;  %876 = vmatpush3.bf16.msra.mxu0 %v923_v14 }
  0x8a   :  { %877 = vmatprep.subr.bf16.mxu0 %v984_v27 }
  0x8d   :  { %878 = vmatpush3.bf16.msra.mxu0 %v924_v24 }
  0x8e   :  { %641 = vmatprep.subr.bf16.mxu0 %v639_v55 }
 0x15b   :  { %v820_v63 = vpop.f32.mrb[0].mxu0 }
 0x15c   :  { %v821_v1 = vpop.f32.mrb[1].mxu0 }
 0x15d   :  { %v822_v2 = vadd.f32 %v821_v1, %v820_v63  ;;  %v823_v3 = vpop.f32.mrb[2].mxu0 }
 0x15e   :  { %v824_v4 = vpop.f32.mrb[3].mxu0  ;;  %v683_v3 = vunpack.c.l.bf16 %v1166_v56 }
 0x15f   :  { %v325_v5 = vadd.f32 %v822_v2, %v762_v0  ;;  %v682_v2 = vunpack.c.l.bf16 %v1169_v57 }
 0x161   :  { %925 = vtanh.f32 %v325_v5 }
 0x16b   :  { %v926_v6 = vpop.eup %925 }
 0x16c   :  { %v331_v8 = vpack.c.bf16 %v926_v6, %v926_v6 }
 0x16e   :  { %856 = vmatmul.mubr.msk.bf16.vlgmr.msra.gmra.mrb[0].mxu1 %vm387_vm3, %v331_v8 }
 0x16f   :  { %860 = vmatpush3.bf16.msra.mxu1 %v917_v7  ;;  %871 = vmatprep.mubr.msk.bf16.mxu1 %vm987_vm2, %v984_v27 }
 0x170   :  { %861 = vmatprep.subr.bf16.mxu1 %v984_v27 }
 0x173   :  { %862 = vmatpush3.bf16.msra.mxu1 %v918_v9 }
 0x174   :  { %863 = vmatprep.subr.bf16.mxu1 %v984_v27 }
 0x177   :  { %864 = vmatpush3.bf16.msra.mxu1 %v919_v10 }
 0x178   :  { %865 = vmatprep.subr.bf16.mxu1 %v984_v27 }
 0x17b   :  { %866 = vmatpush3.bf16.msra.mxu1 %v920_v11 }
 0x17c   :  { %867 = vmatprep.subr.bf16.mxu1 %v984_v27 }
 0x17f   :  { %868 = vmatpush3.bf16.msra.mxu1 %v921_v12 }
 0x180   :  { %869 = vmatprep.subr.bf16.mxu1 %v984_v27 }
 0x183   :  { %870 = vmatpush3.bf16.msra.mxu1 %v922_v13 }
 0x241   :  { %v425_v16 = vpop.f32.mrb[0].mxu1 }
 0x242   :  { %v426_v17 = vadd.f32 %v779_v15, %v425_v16  ;;  %v857_v18 = vpop.f32.mrb[1].mxu1 }
 0x243   :  { %v428_v20 = vpop.f32.mrb[2].mxu1 }
 0x244   :  { %v431_v21 = vmax.f32 %v426_v17, 0.0  ;;  %v858_v22 = vpop.f32.mrb[3].mxu1 }
 0x246   :  { %v432_v23 = vpack.c.bf16 %v431_v21, %v431_v21 }
 0x248   :  { %872 = vmatmul.mubr.msk.bf16.vlgmr.msra.gmra.mrb[4].mxu1 %vm387_vm3, %v432_v23 }
 0x31b   :  { %v525_v26 = vpop.f32.mrb[4].mxu1 }
 0x31c   :  { %v526_v27 = vadd.f32 %v787_v25, %v525_v26  ;;  %v873_v28 = vpop.f32.mrb[5].mxu1 }
 0x31d   :  { %v528_v29 = vpop.f32.mrb[6].mxu1 }
 0x31e   :  { %v531_v30 = vmax.f32 %v526_v27, 0.0  ;;  %v612_v31 = vsub.f32 0.0, %v526_v27  ;;  %v874_v32 = vpop.f32.mrb[7].mxu1 }
 0x320   :  { %v532_v33 = vpack.c.bf16 %v531_v30, %v531_v30  ;;  %v613_v34 = vmul.f32 1.442695, %v612_v31 }
 0x322   :  { %927 = vpow2.f32 %v613_v34  ;;  %880 = vmatmul.mubr.msk.bf16.vlgmr.msra.gmra.mrb[4].mxu0 %vm556_vm4, %v532_v33 }
 0x323   :  { %642 = vmatpush1.bf16.msra.mxu0 %v636_v58  ;;  %673 = vmatprep.mubr.bf16.mxu0 %v990_v59 }
 0x32c   :  { %v928_v35 = vpop.eup %927 }
 0x32d   :  { %v615_v36 = vadd.f32 1.0, %v928_v35 }
 0x32f   :  { %929 = vrcp.f32 %v615_v36 }
 0x339   :  { %v930_v37 = vpop.eup %929 }
 0x33a   :  { %724 = vrot.lane.b32.xlu0 %v930_v37, %s988_s6 }
 0x3ac   :  { %v725_v63 = vpop.permute.xlu0 %724 }
 0x3f5   :  { %v594_v39 = vpop.f32.mrb[4].mxu0 }
 0x3f6   :  { %v595_v40 = vadd.f32 %v795_v38, %v594_v39  ;;  %v881_v41 = vpop.f32.mrb[5].mxu0 }
 0x3f7   :  { %v597_v42 = vpop.f32.mrb[6].mxu0 }
 0x3f8   :  { %v882_v43 = vpop.f32.mrb[7].mxu0  ;;  %v601_v44 = vsel %vm600_vm5, %v595_v40, -inf }
 0x3f9   :  { %602 = vmax.xlane.f32.xlu1 %v601_v44 }
 0x486   :  { %v603_v45 = vpop.xlane.xlu1 %602 }
 0x487   :  { %v604_v46 = vsub.f32 %v595_v40, %v603_v45 }
 0x489   :  { %v605_v47 = vmul.f32 1.442695, %v604_v46 }
 0x48b   :  { %931 = vpow2.f32 %v605_v47 }
 0x495   :  { %v932_v48 = vpop.eup %931 }
 0x496   :  { %v607_v49 = vsel %vm600_vm5, %v932_v48, 0.0 }
 0x497   :  { %608 = vadd.xlane.f32.xlu1 %v607_v49 }
 0x524   :  { %v609_v60 = vpop.xlane.xlu1 %608 }
 0x525   :  { %933 = vrcp.f32 %v609_v60 }
 0x52f   :  { %v934_v61 = vpop.eup %933 }
 0x530   :  { %v611_v62 = vmul.f32 %v934_v61, %v932_v48 }
 0x532   :  { %v727_v0 = vsel %vm600_vm5, %v611_v62, %v725_v63  ;;  %v617_v1 = vpack.c.bf16 %v611_v62, %v611_v62 }
 0x533   :  { %729 = vst.msk [vmem:[#allocation4] sm:$0xff] %vm728_vm8, %v727_v0 }
 0x534   :  { %800 = vmatmul.mubr.msk.bf16.vlgmr.msra.gmra.mrb[8].mxu0 %vm600_vm5, %v617_v1 }
 0x607   :  { %v675_v4 = vpop.f32.mrb[8].mxu0 }
 0x608   :  { %v684_v5 = vmul.f32 %v682_v2, %v675_v4  ;;  %v677_v6 = vpop.f32.mrb[9].mxu0 }
 0x609   :  { %v685_v7 = vmul.f32 %v683_v3, %v677_v6  ;;  %v679_v8 = vpop.f32.mrb[10].mxu0 }
 0x60a   :  { %v680_v9 = vpop.f32.mrb[11].mxu0 }
 0x60b   :  { %v801_v10 = vpack.c.bf16 %v685_v7, %v684_v5 }
 0x60d   :  { %v697_v11 = vrot.slane %v801_v10, %v1095_v19 }
 0x60f   :  { %v698_v12 = vcombine.high %v697_v11, %v697_v11  ;;  %v705_v13 = vrot.slane %v697_v11, %v1095_v19  ;;  %802 = vst.sshfl [vmem:[#allocation2] sm:$0x5 pattern:$0x73625140] %v697_v11 }
 0x611   :  { %v712_v14 = vrot.slane %v698_v12, %v1095_v19  ;;  %v713_v15 = vcombine.high %v705_v13, %v705_v13  ;;  %803 = vst.sshfl [vmem:[#allocation2 + $0x2] sm:$0x5 pattern:$0x73625140] %v698_v12 }
 0x613   :  { %v714_v57 = vcombine.high %v712_v14, %v712_v14  ;;  %721 = vst [vmem:[#allocation2 + $0x4] sm:$0x3] %v713_v15 }
 0x615   :  { %722 = vst [vmem:[#allocation2 + $0x6] sm:$0x3] %v714_v57 }
 0x616   :  { %734 = vsyncadd [#allocation3], 96  ;;  %s991_s10 = smov [#allocation2]  }
 0x617   :  { %s735_s11 = sshll.u32 %s991_s10, 4  ;;  %s736_s11 = int_to_ptr.vmem [resolvable:$true] %s735_s11 }
 0x618   :  { %s935_s19 = scalar_lea.vmem %s736_s11, 32  ;;  %s939_s20 = scalar_lea.vmem %s736_s11, 128 }
 0x619   :  { %p936_p0 = scmp.ne.s32.totalorder %s736_s11, %s935_s19  ;;  %p940_p1 = scmp.lt.s32.totalorder %s736_s11, %s736_s11 }
 0x61a   :  { %p941_p2 = scmp.lt.s32.totalorder %s939_s20, %s935_s19 }
 0x61c   :  { %p942_p3 = por %p941_p2, %p940_p1 }
 0x61e   :  { %p943_p4 = pnand %p942_p3, %p936_p0 }
 0x620   :  { %946 = shalt.err (!%p943_p4)
}
 0x621   :  { %s947_s22 = scalar_lea.hbm %s1290_s12, 32 }
 0x622   :  { %p948_p5 = scmp.ne.s32.totalorder %s1290_s12, %s947_s22  ;;  %p951_p6 = scmp.lt.u32.totalorder %s947_s22, %s1290_s12 }
 0x624   :  { %p953_p7 = pnand %p951_p6, %p948_p5 }
 0x626   :  { %956 = shalt.err (!%p953_p7)
}
 0x627   :  { %s992_s25 = smov 32   ;;  %s993_s26 = smov 2  }
 0x628   :  { %741 = dma.vmem_to_hbm [thread:$0]  %s736_s11, 32, %s1290_s12, [#allocation3], %s992_s25, %s992_s25, %s993_s26  }
 0x629   :  { %746 = vsyncadd [#allocation5], 96  ;;  %s994_s0 = smov [#allocation4]  }
 0x62a   :  { %s747_s3 = sshll.u32 %s994_s0, 4  ;;  %s748_s3 = int_to_ptr.vmem [resolvable:$true] %s747_s3 }
 0x62b   :  { %s957_s29 = scalar_lea.vmem %s748_s3, 32  ;;  %s961_s30 = scalar_lea.vmem %s748_s3, 128 }
 0x62c   :  { %p958_p8 = scmp.ne.s32.totalorder %s748_s3, %s957_s29  ;;  %p962_p9 = scmp.lt.s32.totalorder %s748_s3, %s748_s3 }
 0x62d   :  { %p963_p10 = scmp.lt.s32.totalorder %s961_s30, %s957_s29 }
 0x62f   :  { %p964_p11 = por %p963_p10, %p962_p9 }
 0x631   :  { %p965_p12 = pnand %p964_p11, %p958_p8 }
 0x633   :  { %968 = shalt.err (!%p965_p12)
}
 0x634   :  { %s969_s14 = scalar_lea.hbm %s1291_s13, 32 }
 0x635   :  { %p970_p13 = scmp.ne.s32.totalorder %s1291_s13, %s969_s14  ;;  %p973_p0 = scmp.lt.u32.totalorder %s969_s14, %s1291_s13 }
 0x637   :  { %p975_p1 = pnand %p973_p0, %p970_p13 }
 0x639   :  { %978 = shalt.err (!%p975_p1)
}
 0x63a   :  { %753 = dma.vmem_to_hbm [thread:$0]  %s748_s3, 32, %s1291_s13, [#allocation5], %s992_s25, %s992_s25, %s993_s26  }
 0x63b   :  { %979 = dma.done.wait [#allocation3], 128  }
 0x63c   :  { %980 = vsyncadd [#allocation3], 4294967168 }
 0x63d   :  { %981 = dma.done.wait [#allocation5], 128  }
 0x63e   :  { %982 = vsyncadd [#allocation5], 4294967168 }
 0x63f   :  { %760 = vsyncpa [#allocation3], 1 }
 0x640   :  { %761 = vsyncpa [#allocation5], 1 }

</bundles_post_ra>
